<compile_context>
chip_gen: v7x
topology: tpu7x:2x2x1
jax: 0.10.0
libtpu: 0.0.40
codegen_flags: <defaults>
</compile_context>

<pallas_src>
import jax
import jax.numpy as jnp
from jax.experimental import pallas as pl
from jax.experimental.pallas import tpu as pltpu


def _round_up(n, m):
    return ((n + m - 1) // m) * m


def lin_block_kernel(x_ref, w1t_ref, b1_ref, w2t_ref, b2_ref, o_ref):
    # x_ref:   (bb, in)        activation block, bf16 (MXU operand dtype)
    # w1t_ref: (in, between)   first Linear weight, pre-transposed, bf16
    # b1_ref:  (1, between)    f32
    # w2t_ref: (between, out)  second Linear weight, pre-transposed, bf16
    # b2_ref:  (1, out)        f32
    # o_ref:   (bb, out)       f32
    w1t = w1t_ref[...]
    w2t = w2t_ref[...]

    # MXU dot #1: bf16 x bf16 -> f32 accumulate.
    h = jnp.dot(x_ref[...], w1t, preferred_element_type=jnp.float32)
    # Bias add + ReLU stay in f32 on the VPU (v5e-safe).
    h = jnp.maximum(h + b1_ref[...], 0.0)

    # MXU dot #2: downcast only the matmul operand; accumulate in f32.
    y = jnp.dot(h.astype(w2t.dtype), w2t, preferred_element_type=jnp.float32)
    o_ref[...] = (y + b2_ref[...]).astype(o_ref.dtype)


def prepare_lin_block_params(w1, b1, w2, b2, *, mxu_dtype=jnp.bfloat16):
    """One-time parameter layout prep (do at init time, NOT per forward call).

    w1: (inbetw, in)  PyTorch nn.Linear layout     b1: (inbetw,)
    w2: (out, inbetw)                              b2: (out,)
    Returns (w1t, b1r, w2t, b2r) in kernel-ready layout/dtype.
    """
    w1t = jnp.transpose(w1).astype(mxu_dtype)          # (in, between)
    w2t = jnp.transpose(w2).astype(mxu_dtype)          # (between, out)
    b1r = b1.reshape(1, -1).astype(jnp.float32)        # (1, between)
    b2r = b2.reshape(1, -1).astype(jnp.float32)        # (1, out)
    return w1t, b1r, w2t, b2r


def lin_block_forward(x, w1t, b1r, w2t, b2r, *, block_b=1024):
    """LinBlock forward (eval mode: Dropout == identity).

    x : (B, in)  any float dtype (streamed to the MXU operand dtype)
    w1t/b1r/w2t/b2r: outputs of prepare_lin_block_params
    returns (B, out) f32
    """
    B, in_size = x.shape
    between = w1t.shape[1]
    out_size = w2t.shape[1]

    # Stream x in the MXU operand dtype (halves HBM read traffic at large B).
    x_in = x if x.dtype == w1t.dtype else x.astype(w1t.dtype)

    if B <= block_b:
        bb = B                                   # single grid step, full-B block
    else:
        # At least 2 grid steps so v7x's two TensorCores both get a share of
        # the "parallel" batch axis; keep the tile 16-row aligned (bf16 sublane
        # packing) since the block no longer spans the full batch dim.
        bb = min(block_b, _round_up(pl.cdiv(B, 2), 16))
    grid = (pl.cdiv(B, bb),)

    return pl.pallas_call(
        lin_block_kernel,
        out_shape=jax.ShapeDtypeStruct((B, out_size), jnp.float32),
        grid_spec=pl.GridSpec(
            grid=grid,
            in_specs=[
                pl.BlockSpec((bb, in_size), lambda i: (i, 0)),        # x, blocked over batch
                pl.BlockSpec((in_size, between), lambda i: (0, 0)),   # w1t, VMEM-resident
                pl.BlockSpec((1, between), lambda i: (0, 0)),         # b1, resident
                pl.BlockSpec((between, out_size), lambda i: (0, 0)),  # w2t, resident
                pl.BlockSpec((1, out_size), lambda i: (0, 0)),        # b2, resident
            ],
            out_specs=pl.BlockSpec((bb, out_size), lambda i: (i, 0)),
        ),
        compiler_params=pltpu.CompilerParams(
            dimension_semantics=("parallel",),
        ),
    )(x_in, w1t, b1r, w2t, b2r)


def reference_forward(x, w1, b1, w2, b2):
    """Pure-JAX f32 reference with identical math (eval-mode LinBlock)."""
    h = jnp.maximum(x @ w1.T + b1, 0.0)
    return h @ w2.T + b2


if __name__ == "__main__":
    # Small shapes consistent with the module's typical use:
    #   in_lin_size=64, inbetw_lin_size=32, out_lin_size=50, dropout=0.25 (identity at eval)
    B, IN, BETWEEN, OUT = 8, 64, 32, 50

    key = jax.random.PRNGKey(0)
    kx, kw1, kb1, kw2, kb2, kx2 = jax.random.split(key, 6)

    def unif(k, shape, fan_in):
        bound = 1.0 / jnp.sqrt(jnp.float32(fan_in))
        return jax.random.uniform(k, shape, jnp.float32, -bound, bound)

    x = jax.random.normal(kx, (B, IN), jnp.float32)
    w1 = unif(kw1, (BETWEEN, IN), IN)        # PyTorch nn.Linear weight layout (out, in)
    b1 = unif(kb1, (BETWEEN,), IN)
    w2 = unif(kw2, (OUT, BETWEEN), BETWEEN)
    b2 = unif(kb2, (OUT,), BETWEEN)

    # One-time layout prep (parameter-init time).
    params = prepare_lin_block_params(w1, b1, w2, b2)

    # --- tiny batch (single grid step) ---
    out = jax.block_until_ready(lin_block_forward(x, *params))
    ref = jax.block_until_ready(reference_forward(x, w1, b1, w2, b2))
    assert out.shape == (B, OUT)
    # bf16 MXU operands + f32 accumulation: loosen tolerance slightly vs pure-f32.
    assert jnp.allclose(out, ref, atol=1e-2, rtol=1e-2), "mismatch vs reference (B=8)"

    # --- larger batch: exercises ≥2 grid steps + partial trailing block ---
    B2 = 1030
    x2 = jax.random.normal(kx2, (B2, IN), jnp.float32)
    out2 = jax.block_until_ready(lin_block_forward(x2, *params))
    ref2 = jax.block_until_ready(reference_forward(x2, w1, b1, w2, b2))
    assert out2.shape == (B2, OUT)
    assert jnp.allclose(out2, ref2, atol=1e-2, rtol=1e-2), "mismatch vs reference (B=1030)"

    # TODO(synk): training-mode Dropout (stochastic masking) intentionally omitted;
    # eval-mode semantics (identity) are implemented.
    print("KERNEL_OK")
</pallas_src>

<mosaic_0001>
module attributes {stable_mosaic.version = 11 : i64} {
  func.func @lin_block_kernel(%arg0: i32, %arg1: memref<8x64xbf16, #tpu.memory_space<vmem>>, %arg2: memref<64x32xbf16, #tpu.memory_space<vmem>>, %arg3: memref<1x32xf32, #tpu.memory_space<vmem>>, %arg4: memref<32x50xbf16, #tpu.memory_space<vmem>>, %arg5: memref<1x50xf32, #tpu.memory_space<vmem>>, %arg6: memref<8x50xf32, #tpu.memory_space<vmem>>) attributes {dimension_semantics = [#tpu.dimension_semantics<parallel>], iteration_bounds = array<i64: 1>, scalar_prefetch = 0 : i64, scratch_operands = 0 : i64, tpu.core_type = #tpu.core_type<tc>, window_params = [{transform_indices = @transform_0, window_bounds = array<i64: 8, 64>}, {pipeline_mode = #tpu.pipeline_mode<synchronous>, transform_indices = @transform_1, window_bounds = array<i64: 64, 32>}, {pipeline_mode = #tpu.pipeline_mode<synchronous>, transform_indices = @transform_2, window_bounds = array<i64: 1, 32>}, {pipeline_mode = #tpu.pipeline_mode<synchronous>, transform_indices = @transform_3, window_bounds = array<i64: 32, 50>}, {pipeline_mode = #tpu.pipeline_mode<synchronous>, transform_indices = @transform_4, window_bounds = array<i64: 1, 50>}, {transform_indices = @transform_5, window_bounds = array<i64: 8, 50>}]} {
    %c0 = arith.constant 0 : index
    %c0_0 = arith.constant 0 : index
    %0 = vector.load %arg2[%c0, %c0_0] : memref<64x32xbf16, #tpu.memory_space<vmem>>, vector<64x32xbf16>
    %c0_1 = arith.constant 0 : index
    %c0_2 = arith.constant 0 : index
    %1 = vector.load %arg4[%c0_1, %c0_2] : memref<32x50xbf16, #tpu.memory_space<vmem>>, vector<32x50xbf16>
    %c0_3 = arith.constant 0 : index
    %c0_4 = arith.constant 0 : index
    %2 = vector.load %arg1[%c0_3, %c0_4] : memref<8x64xbf16, #tpu.memory_space<vmem>>, vector<8x64xbf16>
    %cst = arith.constant dense<0.000000e+00> : vector<8x32xf32>
    %3 = tpu.matmul %2, %0, %cst {dimension_numbers = #tpu.dot_dimension_numbers<[1], [0], [0], [1], [0, 0, 1, 1], [], []>} : vector<8x64xbf16>, vector<64x32xbf16>, vector<8x32xf32> -> vector<8x32xf32>
    %c0_5 = arith.constant 0 : index
    %c0_6 = arith.constant 0 : index
    %4 = vector.load %arg3[%c0_5, %c0_6] : memref<1x32xf32, #tpu.memory_space<vmem>>, vector<1x32xf32>
    %5 = vector.broadcast %4 : vector<1x32xf32> to vector<8x32xf32>
    %6 = arith.addf %3, %5 : vector<8x32xf32>
    %cst_7 = arith.constant 0.000000e+00 : f32
    %7 = vector.broadcast %cst_7 : f32 to vector<8x32xf32>
    %8 = arith.maximumf %6, %7 : vector<8x32xf32>
    %9 = arith.truncf %8 : vector<8x32xf32> to vector<8x32xbf16>
    %cst_8 = arith.constant dense<0.000000e+00> : vector<8x50xf32>
    %10 = tpu.matmul %9, %1, %cst_8 {dimension_numbers = #tpu.dot_dimension_numbers<[1], [0], [0], [1], [0, 0, 1, 1], [], []>} : vector<8x32xbf16>, vector<32x50xbf16>, vector<8x50xf32> -> vector<8x50xf32>
    %c0_9 = arith.constant 0 : index
    %c0_10 = arith.constant 0 : index
    %11 = vector.load %arg5[%c0_9, %c0_10] : memref<1x50xf32, #tpu.memory_space<vmem>>, vector<1x50xf32>
    %12 = vector.broadcast %11 : vector<1x50xf32> to vector<8x50xf32>
    %13 = arith.addf %10, %12 : vector<8x50xf32>
    %c0_11 = arith.constant 0 : index
    %c0_12 = arith.constant 0 : index
    %14 = vector.load %arg6[%c0_11, %c0_12] : memref<8x50xf32, #tpu.memory_space<vmem>>, vector<8x50xf32>
    tpu.vector_store %arg6[%c0_11, %c0_12], %13 {strides = array<i32>} : memref<8x50xf32, #tpu.memory_space<vmem>>, vector<8x50xf32>,
    return
  }
  func.func @transform_0(%arg0: i32) -> (i32, i32) {
    %c0_i32 = arith.constant 0 : i32
    %c0_i32_0 = arith.constant 0 : i32
    return %arg0, %c0_i32 : i32, i32
  }
  func.func @transform_1(%arg0: i32) -> (i32, i32) {
    %c0_i32 = arith.constant 0 : i32
    %c0_i32_0 = arith.constant 0 : i32
    %c0_i32_1 = arith.constant 0 : i32
    return %c0_i32, %c0_i32_0 : i32, i32
  }
  func.func @transform_2(%arg0: i32) -> (i32, i32) {
    %c0_i32 = arith.constant 0 : i32
    %c0_i32_0 = arith.constant 0 : i32
    %c0_i32_1 = arith.constant 0 : i32
    return %c0_i32, %c0_i32_0 : i32, i32
  }
  func.func @transform_3(%arg0: i32) -> (i32, i32) {
    %c0_i32 = arith.constant 0 : i32
    %c0_i32_0 = arith.constant 0 : i32
    %c0_i32_1 = arith.constant 0 : i32
    return %c0_i32, %c0_i32_0 : i32, i32
  }
  func.func @transform_4(%arg0: i32) -> (i32, i32) {
    %c0_i32 = arith.constant 0 : i32
    %c0_i32_0 = arith.constant 0 : i32
    %c0_i32_1 = arith.constant 0 : i32
    return %c0_i32, %c0_i32_0 : i32, i32
  }
  func.func @transform_5(%arg0: i32) -> (i32, i32) {
    %c0_i32 = arith.constant 0 : i32
    %c0_i32_0 = arith.constant 0 : i32
    return %arg0, %c0_i32 : i32, i32
  }
}

</mosaic_0001>

<bundles_post_ra>
// kernel: tpu_custom_call.1
= control target key start
LH: loop header
LB: loop body
LE: loop exit
PB: predicated region body
PF: predicated region fallthrough
CT: control target
= control target key end

     0   :  { %v262_v1 = vmov 0.0   ;;  %vm263_vm0 = vmmov 0   ;;  %s334_s0 = inlined_call_operand.vmem [shape: bf16[8,64], index: 0, kind: input, shape index: {}]   ;;  %s335_s1 = inlined_call_operand.vmem [shape: bf16[64,32], index: 1, kind: input, shape index: {}]   ;;  %s336_s2 = inlined_call_operand.vmem [shape: f32[1,32], index: 2, kind: input, shape index: {}]   ;;  %s337_s3 = inlined_call_operand.vmem [shape: bf16[32,50], index: 3, kind: input, shape index: {}]   ;;  %s338_s4 = inlined_call_operand.vmem [shape: f32[1,50], index: 4, kind: input, shape index: {}]   ;;  %s339_s5 = inlined_call_operand.hbm [shape: f32[8,50], index: 5, kind: output, shape index: {}]  }
   0x1   :  { %v232_v0 = vld [vmem:[%s335_s1] sm:$0xff]   ;;  %209 = vmatprep.subr.bf16.mxu0 %v262_v1  ;;  %221 = vmatprep.subr.bf16.mxu1 %v262_v1  ;;  %v233_v2 = vld [vmem:[%s335_s1 + $0x8] sm:$0xff]   ;;  %v234_v3 = vld [vmem:[%s335_s1 + $0x10] sm:$0xff]  }
   0x2   :  { %210 = vmatpush3.bf16.msra.mxu0 %v232_v0  ;;  %217 = vmatprep.mubr.msk.bf16.mxu0 %vm263_vm0, %v262_v1 }
   0x3   :  { %211 = vmatprep.subr.bf16.mxu0 %v262_v1  ;;  %225 = vmatprep.mubr.msk.bf16.mxu1 %vm263_vm0, %v262_v1 }
   0x6   :  { %212 = vmatpush3.bf16.msra.mxu0 %v233_v2 }
   0x7   :  { %10 = vsyncpa [#allocation3], 0  ;;  %213 = vmatprep.subr.bf16.mxu0 %v262_v1  ;;  %v235_v4 = vld [vmem:[%s335_s1 + $0x18] sm:$0xff]   ;;  %v34_v5 = vld [vmem:[%s334_s0] sm:$0xf]  ;;  %vm66_vm1 = vcmask 523264  }
   0x8   :  { %v236_v6 = vld [vmem:[%s337_s3] sm:$0xff]   ;;  %v237_v7 = vld [vmem:[%s337_s3 + $0x8] sm:$0xff]   ;;  %vm131_vm2 = vcmask 261120   ;;  %s264_s9 = smov [#allocation2]   ;;  %vm175_vm3 = vcmask 408576  }
   0x9   :  { %222 = vmatpush3.bf16.msra.mxu1 %v236_v6  ;;  %v191_v8 = vld [vmem:[%s336_s2] ss:$0 sm:$0xff]  ;;  %s183_s3 = sshll.u32 %s264_s9, 4  ;;  %s184_s3 = int_to_ptr.vmem [resolvable:$true] %s183_s3 }
   0xa   :  { %214 = vmatpush3.bf16.msra.mxu0 %v234_v3  ;;  %223 = vmatprep.subr.bf16.mxu1 %v262_v1  ;;  %v197_v16 = vld [vmem:[%s338_s4] ss:$0 sm:$0xff]  ;;  %s238_s2 = scalar_lea.vmem %s184_s3, 128  ;;  %p243_p1 = scmp.lt.s32.totalorder %s184_s3, %s184_s3 }
   0xb   :  { %215 = vmatprep.subr.bf16.mxu0 %v262_v1  ;;  %p239_p0 = scmp.ne.s32.totalorder %s184_s3, %s238_s2  ;;  %p244_p2 = scmp.lt.s32.totalorder %s238_s2, %s238_s2 }
   0xd   :  { %224 = vmatpush3.bf16.msra.mxu1 %v237_v7  ;;  %p245_p3 = por %p244_p2, %p243_p1 }
   0xe   :  { %216 = vmatpush3.bf16.msra.mxu0 %v235_v4 }
   0xf   :  { %p246_p4 = pnand %p245_p3, %p239_p0 }
  0x11   :  { %218 = vmatmul.mubr.msk.bf16.vlgmr.msra.gmra.mrb[0].mxu0 %vm66_vm1, %v34_v5 }
  0xe4   :  { %v104_v9 = vpop.f32.mrb[0].mxu0 }
  0xe5   :  { %v105_v10 = vadd.f32 %v191_v8, %v104_v9  ;;  %v219_v11 = vpop.f32.mrb[1].mxu0 }
  0xe6   :  { %v107_v12 = vpop.f32.mrb[2].mxu0 }
  0xe7   :  { %v110_v13 = vmax.f32 %v105_v10, 0.0  ;;  %v220_v14 = vpop.f32.mrb[3].mxu0 }
  0xe9   :  { %v111_v15 = vpack.c.bf16 %v110_v13, %v110_v13 }
  0xeb   :  { %226 = vmatmul.mubr.msk.bf16.vlgmr.msra.gmra.mrb[0].mxu1 %vm131_vm2, %v111_v15 }
 0x1be   :  { %v169_v17 = vpop.f32.mrb[0].mxu1 }
 0x1bf   :  { %v170_v18 = vadd.f32 %v197_v16, %v169_v17  ;;  %v227_v19 = vpop.f32.mrb[1].mxu1 }
 0x1c0   :  { %v172_v20 = vpop.f32.mrb[2].mxu1 }
 0x1c1   :  { %v228_v21 = vpop.f32.mrb[3].mxu1  ;;  %176 = vst.msk [vmem:[#allocation2] sm:$0xff] %vm175_vm3, %v170_v18 }
 0x1c2   :  { %249 = shalt.err (!%p246_p4)
}
 0x1c3   :  { %s250_s4 = scalar_lea.hbm %s339_s5, 128 }
 0x1c4   :  { %p251_p5 = scmp.ne.s32.totalorder %s339_s5, %s250_s4  ;;  %p254_p6 = scmp.lt.u32.totalorder %s250_s4, %s339_s5 }
 0x1c6   :  { %p256_p7 = pnand %p254_p6, %p251_p5 }
 0x1c8   :  { %259 = shalt.err (!%p256_p7)
}
 0x1c9   :  { %186 = dma.vmem_to_hbm [thread:$0]  %s184_s3, 128, %s339_s5, [#allocation3]  }
 0x1ca   :  { %260 = dma.done.wait [#allocation3], 128  }
 0x1cb   :  { %261 = vsyncadd [#allocation3], 4294967168 }
 0x1cc   :  { %190 = vsyncpa [#allocation3], 1 }

</bundles_post_ra>
